<compile_context>
chip_gen: v7x
topology: tpu7x:2x2x1
jax: 0.10.0
libtpu: 0.0.40
codegen_flags: <defaults>
</compile_context>

<pallas_src>
import jax
import jax.numpy as jnp
from jax.experimental import pallas as pl
from jax.experimental.pallas import tpu as pltpu


# ----------------------------------------------------------------------------
# Kernels
# ----------------------------------------------------------------------------
def _ff_kernel_full(x_ref, w1_ref, b1_ref, w2_ref, b2_ref, o_ref):
    # Full hidden dim per step (k_steps == 1): weights are VMEM-resident
    # (constant index map), no accumulator scratch, single lane-dense store.
    h = jnp.dot(x_ref[...], w1_ref[...], preferred_element_type=jnp.float32)
    h = jax.nn.gelu(h + b1_ref[...])                       # tanh-approx GELU
    out = jnp.dot(h.astype(w2_ref.dtype), w2_ref[...],
                  preferred_element_type=jnp.float32)
    o_ref[...] = (out + b2_ref[...]).astype(o_ref.dtype)


def _ff_kernel_ktiled(x_ref, w1_ref, b1_ref, w2_ref, b2_ref, o_ref, acc_ref):
    # Hidden-dim reduction tiled over grid axis 1 ("arbitrary"); output block is
    # resident across that axis, partial products accumulate in f32 VMEM scratch.
    k = pl.program_id(1)

    @pl.when(k == 0)
    def _():
        acc_ref[...] = jnp.zeros_like(acc_ref)

    h = jnp.dot(x_ref[...], w1_ref[...], preferred_element_type=jnp.float32)
    h = jax.nn.gelu(h + b1_ref[...])
    acc_ref[...] += jnp.dot(h.astype(w2_ref.dtype), w2_ref[...],
                            preferred_element_type=jnp.float32)

    @pl.when(k == pl.num_programs(1) - 1)
    def _():
        o_ref[...] = (acc_ref[...] + b2_ref[...]).astype(o_ref.dtype)


# ----------------------------------------------------------------------------
# Tiling heuristics
# ----------------------------------------------------------------------------
_WEIGHT_RESIDENT_BUDGET = 40 << 20   # leave headroom inside v7x's 64 MiB VMEM
_VMEM_LIMIT_CAP = 48 << 20


def _vmem_bytes(tm, e, th, k_steps, w_isz, x_isz, o_isz):
    x_b = 2 * tm * e * x_isz               # double-buffered x tile
    o_b = 2 * tm * e * o_isz               # double-buffered out tile
    w_b = 2 * 2 * e * th * w_isz           # w1 + w2 tiles, double-buffered
    b_b = 2 * (th + e) * 4                 # bias tiles (f32)
    h_b = tm * th * 4                      # f32 GELU intermediate
    acc_b = tm * e * 4 if k_steps > 1 else 0
    return x_b + o_b + w_b + b_b + h_b + acc_b


def _pick_tm(M):
    preferred = (512, 256, 128, 64, 32, 16, 8)
    # Largest preferred tile that divides M and still leaves >= 2 row tiles
    # (so the "parallel" axis can shard across v7x's two TensorCores).
    for cand in preferred:
        if M % cand == 0 and M // cand >= 2:
            return cand
    for cand in preferred:
        if M % cand == 0:
            return cand
    return M                               # full-array block is always legal


# ----------------------------------------------------------------------------
# Wrapper: Chunk(chunks, FeedForward(e), along_dim=-2).forward(x)
# ----------------------------------------------------------------------------
def chunk_feedforward(x, w1, b1, w2, b2, *, chunks, along_dim=-2, tm=None, th=None):
    """x: (b, t, e); w1: (e, hidden); b1: (hidden,); w2: (hidden, e); b2: (e,).

    `chunks` / `along_dim` are kept for interface parity with the PyTorch module.
    fn is position-wise, so the chunk split/concat has no numeric effect; the
    Pallas grid provides the memory bound that chunking provides in PyTorch.
    """
    assert x.ndim == 3
    b, t, e = x.shape
    assert along_dim in (-2, 1), "reformer usage: chunk the sequence axis"
    hidden = w1.shape[1]
    assert w1.shape == (e, hidden) and w2.shape == (hidden, e)
    assert b1.shape == (hidden,) and b2.shape == (e,)
    assert chunks >= 1

    M = b * t
    out_dtype = x.dtype

    # bf16 operands for the MXU; f32 accumulation inside the kernel.
    x2 = x.reshape(M, e).astype(jnp.bfloat16)
    w1c = w1.astype(jnp.bfloat16)
    w2c = w2.astype(jnp.bfloat16)
    b1_2 = b1.reshape(1, hidden).astype(jnp.float32)
    b2_2 = b2.reshape(1, e).astype(jnp.float32)

    w_isz = w1c.dtype.itemsize
    x_isz = x2.dtype.itemsize
    o_isz = jnp.dtype(out_dtype).itemsize

    if tm is None:
        tm = _pick_tm(M)
    assert (M % tm == 0) and (tm % 8 == 0 or tm == M)

    if th is None:
        if _vmem_bytes(tm, e, hidden, 1, w_isz, x_isz, o_isz) <= _WEIGHT_RESIDENT_BUDGET:
            th = hidden                                    # weights VMEM-resident
        else:
            th = 128 if hidden % 128 == 0 else hidden
            for cand in (2048, 1024, 512, 256):
                if hidden % cand == 0 and _vmem_bytes(
                        tm, e, cand, hidden // cand, w_isz, x_isz, o_isz
                ) <= _WEIGHT_RESIDENT_BUDGET:
                    th = cand
                    break
    assert hidden % th == 0 and (th % 128 == 0 or th == hidden)

    n_row_tiles = M // tm
    k_steps = hidden // th

    vmem_est = _vmem_bytes(tm, e, th, k_steps, w_isz, x_isz, o_isz)
    vmem_limit = int(min(_VMEM_LIMIT_CAP, max(2 * vmem_est, 16 << 20)))

    if k_steps == 1:
        out = pl.pallas_call(
            _ff_kernel_full,
            grid=(n_row_tiles,),
            in_specs=[
                pl.BlockSpec((tm, e), lambda i: (i, 0)),
                pl.BlockSpec((e, hidden), lambda i: (0, 0)),   # constant -> loaded once
                pl.BlockSpec((1, hidden), lambda i: (0, 0)),
                pl.BlockSpec((hidden, e), lambda i: (0, 0)),   # constant -> loaded once
                pl.BlockSpec((1, e), lambda i: (0, 0)),
            ],
            out_specs=pl.BlockSpec((tm, e), lambda i: (i, 0)),
            out_shape=jax.ShapeDtypeStruct((M, e), out_dtype),
            compiler_params=pltpu.CompilerParams(
                dimension_semantics=("parallel",),
                vmem_limit_bytes=vmem_limit,
            ),
        )(x2, w1c, b1_2, w2c, b2_2)
    else:
        out = pl.pallas_call(
            _ff_kernel_ktiled,
            grid=(n_row_tiles, k_steps),
            in_specs=[
                pl.BlockSpec((tm, e), lambda i, k: (i, 0)),
                pl.BlockSpec((e, th), lambda i, k: (0, k)),
                pl.BlockSpec((1, th), lambda i, k: (0, k)),
                pl.BlockSpec((th, e), lambda i, k: (k, 0)),
                pl.BlockSpec((1, e), lambda i, k: (0, 0)),
            ],
            out_specs=pl.BlockSpec((tm, e), lambda i, k: (i, 0)),
            out_shape=jax.ShapeDtypeStruct((M, e), out_dtype),
            scratch_shapes=[pltpu.VMEM((tm, e), jnp.float32)],
            compiler_params=pltpu.CompilerParams(
                dimension_semantics=("parallel", "arbitrary"),
                vmem_limit_bytes=vmem_limit,
            ),
        )(x2, w1c, b1_2, w2c, b2_2)

    return out.reshape(b, t, e)


# ----------------------------------------------------------------------------
# Demo + check against the literal Chunk.forward (split -> fn -> concat)
# ----------------------------------------------------------------------------
if __name__ == "__main__":
    b, t, e = 2, 64, 128          # small shapes, lane-dense embedding
    chunks = 4                    # Chunk(chunks=4, FeedForward(e), along_dim=-2)
    hidden = 4 * e                # reformer FeedForward mult=4

    key = jax.random.PRNGKey(0)
    kx, k1, kb1, k2, kb2 = jax.random.split(key, 5)
    x = jax.random.normal(kx, (b, t, e), jnp.float32)
    w1 = jax.random.normal(k1, (e, hidden), jnp.float32) * (e ** -0.5)
    b1 = jax.random.normal(kb1, (hidden,), jnp.float32) * 0.02
    w2 = jax.random.normal(k2, (hidden, e), jnp.float32) * (hidden ** -0.5)
    b2 = jax.random.normal(kb2, (e,), jnp.float32) * 0.02

    # Literal Chunk.forward reference: x.chunk(chunks, dim=-2) -> fn -> cat(dim=-2)
    def ff_ref(c):
        return jax.nn.gelu(c @ w1 + b1) @ w2 + b2

    ref = jnp.concatenate([ff_ref(c) for c in jnp.split(x, chunks, axis=-2)], axis=-2)

    # 1) default heuristics: weights VMEM-resident, k_steps == 1, no scratch.
    out = chunk_feedforward(x, w1, b1, w2, b2, chunks=chunks, along_dim=-2)
    out = jax.block_until_ready(out)
    assert out.shape == (b, t, e), out.shape
    assert bool(jnp.all(jnp.isfinite(out)))
    err = float(jnp.max(jnp.abs(out - ref)))
    assert err < 5e-2, f"max abs error (resident path) {err}"

    # 2) forced hidden-dim tiling: exercises the k-tiled accumulator kernel.
    out2 = chunk_feedforward(x, w1, b1, w2, b2, chunks=chunks, along_dim=-2,
                             tm=64, th=128)
    out2 = jax.block_until_ready(out2)
    assert bool(jnp.all(jnp.isfinite(out2)))
    err2 = float(jnp.max(jnp.abs(out2 - ref)))
    assert err2 < 5e-2, f"max abs error (k-tiled path) {err2}"

    print("KERNEL_OK")
</pallas_src>

<mosaic_0001>
module attributes {stable_mosaic.version = 11 : i64} {
  func.func @_ff_kernel_full(%arg0: i32, %arg1: memref<64x128xbf16, #tpu.memory_space<vmem>>, %arg2: memref<128x512xbf16, #tpu.memory_space<vmem>>, %arg3: memref<1x512xf32, #tpu.memory_space<vmem>>, %arg4: memref<512x128xbf16, #tpu.memory_space<vmem>>, %arg5: memref<1x128xf32, #tpu.memory_space<vmem>>, %arg6: memref<64x128xf32, #tpu.memory_space<vmem>>) attributes {dimension_semantics = [#tpu.dimension_semantics<parallel>], iteration_bounds = array<i64: 2>, scalar_prefetch = 0 : i64, scratch_operands = 0 : i64, tpu.core_type = #tpu.core_type<tc>, window_params = [{transform_indices = @transform_0, window_bounds = array<i64: 64, 128>}, {pipeline_mode = #tpu.pipeline_mode<synchronous>, transform_indices = @transform_1, window_bounds = array<i64: 128, 512>}, {pipeline_mode = #tpu.pipeline_mode<synchronous>, transform_indices = @transform_2, window_bounds = array<i64: 1, 512>}, {pipeline_mode = #tpu.pipeline_mode<synchronous>, transform_indices = @transform_3, window_bounds = array<i64: 512, 128>}, {pipeline_mode = #tpu.pipeline_mode<synchronous>, transform_indices = @transform_4, window_bounds = array<i64: 1, 128>}, {transform_indices = @transform_5, window_bounds = array<i64: 64, 128>}]} {
    %c0 = arith.constant 0 : index
    %c0_0 = arith.constant 0 : index
    %0 = vector.load %arg1[%c0, %c0_0] : memref<64x128xbf16, #tpu.memory_space<vmem>>, vector<64x128xbf16>
    %c0_1 = arith.constant 0 : index
    %c0_2 = arith.constant 0 : index
    %1 = vector.load %arg2[%c0_1, %c0_2] : memref<128x512xbf16, #tpu.memory_space<vmem>>, vector<128x512xbf16>
    %cst = arith.constant dense<0.000000e+00> : vector<64x512xf32>
    %2 = tpu.matmul %0, %1, %cst {dimension_numbers = #tpu.dot_dimension_numbers<[1], [0], [0], [1], [0, 0, 1, 1], [], []>} : vector<64x128xbf16>, vector<128x512xbf16>, vector<64x512xf32> -> vector<64x512xf32>
    %c0_3 = arith.constant 0 : index
    %c0_4 = arith.constant 0 : index
    %3 = vector.load %arg3[%c0_3, %c0_4] : memref<1x512xf32, #tpu.memory_space<vmem>>, vector<1x512xf32>
    %4 = vector.broadcast %3 : vector<1x512xf32> to vector<64x512xf32>
    %5 = arith.addf %2, %4 : vector<64x512xf32>
    %6 = arith.mulf %5, %5 : vector<64x512xf32>
    %7 = arith.mulf %5, %6 : vector<64x512xf32>
    %cst_5 = arith.constant 4.471500e-02 : f32
    %8 = vector.broadcast %cst_5 : f32 to vector<64x512xf32>
    %9 = arith.mulf %8, %7 : vector<64x512xf32>
    %10 = arith.addf %5, %9 : vector<64x512xf32>
    %cst_6 = arith.constant 0.797884583 : f32
    %11 = vector.broadcast %cst_6 : f32 to vector<64x512xf32>
    %12 = arith.mulf %11, %10 : vector<64x512xf32>
    %13 = math.tanh %12 : vector<64x512xf32>
    %cst_7 = arith.constant 1.000000e+00 : f32
    %14 = vector.broadcast %cst_7 : f32 to vector<64x512xf32>
    %15 = arith.addf %14, %13 : vector<64x512xf32>
    %cst_8 = arith.constant 5.000000e-01 : f32
    %16 = vector.broadcast %cst_8 : f32 to vector<64x512xf32>
    %17 = arith.mulf %16, %15 : vector<64x512xf32>
    %18 = arith.mulf %5, %17 : vector<64x512xf32>
    %19 = arith.truncf %18 : vector<64x512xf32> to vector<64x512xbf16>
    %c0_9 = arith.constant 0 : index
    %c0_10 = arith.constant 0 : index
    %20 = vector.load %arg4[%c0_9, %c0_10] : memref<512x128xbf16, #tpu.memory_space<vmem>>, vector<512x128xbf16>
    %cst_11 = arith.constant dense<0.000000e+00> : vector<64x128xf32>
    %21 = tpu.matmul %19, %20, %cst_11 {dimension_numbers = #tpu.dot_dimension_numbers<[1], [0], [0], [1], [0, 0, 1, 1], [], []>} : vector<64x512xbf16>, vector<512x128xbf16>, vector<64x128xf32> -> vector<64x128xf32>
    %c0_12 = arith.constant 0 : index
    %c0_13 = arith.constant 0 : index
    %22 = vector.load %arg5[%c0_12, %c0_13] : memref<1x128xf32, #tpu.memory_space<vmem>>, vector<1x128xf32>
    %23 = vector.broadcast %22 : vector<1x128xf32> to vector<64x128xf32>
    %24 = arith.addf %21, %23 : vector<64x128xf32>
    %c0_14 = arith.constant 0 : index
    %c0_15 = arith.constant 0 : index
    %25 = vector.load %arg6[%c0_14, %c0_15] : memref<64x128xf32, #tpu.memory_space<vmem>>, vector<64x128xf32>
    tpu.vector_store %arg6[%c0_14, %c0_15], %24 {strides = array<i32>} : memref<64x128xf32, #tpu.memory_space<vmem>>, vector<64x128xf32>,
    return
  }
  func.func @transform_0(%arg0: i32) -> (i32, i32) {
    %c0_i32 = arith.constant 0 : i32
    %c0_i32_0 = arith.constant 0 : i32
    return %arg0, %c0_i32 : i32, i32
  }
  func.func @transform_1(%arg0: i32) -> (i32, i32) {
    %c0_i32 = arith.constant 0 : i32
    %c0_i32_0 = arith.constant 0 : i32
    %c0_i32_1 = arith.constant 0 : i32
    return %c0_i32, %c0_i32_0 : i32, i32
  }
  func.func @transform_2(%arg0: i32) -> (i32, i32) {
    %c0_i32 = arith.constant 0 : i32
    %c0_i32_0 = arith.constant 0 : i32
    %c0_i32_1 = arith.constant 0 : i32
    return %c0_i32, %c0_i32_0 : i32, i32
  }
  func.func @transform_3(%arg0: i32) -> (i32, i32) {
    %c0_i32 = arith.constant 0 : i32
    %c0_i32_0 = arith.constant 0 : i32
    %c0_i32_1 = arith.constant 0 : i32
    return %c0_i32, %c0_i32_0 : i32, i32
  }
  func.func @transform_4(%arg0: i32) -> (i32, i32) {
    %c0_i32 = arith.constant 0 : i32
    %c0_i32_0 = arith.constant 0 : i32
    %c0_i32_1 = arith.constant 0 : i32
    return %c0_i32, %c0_i32_0 : i32, i32
  }
  func.func @transform_5(%arg0: i32) -> (i32, i32) {
    %c0_i32 = arith.constant 0 : i32
    %c0_i32_0 = arith.constant 0 : i32
    return %arg0, %c0_i32 : i32, i32
  }
}

</mosaic_0001>

<bundles_post_ra>
// kernel: tpu_custom_call.1
= control target key start
LH: loop header
LB: loop body
LE: loop exit
PB: predicated region body
PF: predicated region fallthrough
CT: control target
= control target key end

     0   :  { %10 = vsyncpa [#allocation3], 0  ;;  %s2740_s0 = inlined_call_operand.hbm [shape: bf16[128,128], index: 0, kind: input, shape index: {}]   ;;  %s2741_s1 = inlined_call_operand.hbm [shape: bf16[128,512], index: 1, kind: input, shape index: {}]   ;;  %s2742_s2 = inlined_call_operand.vmem [shape: f32[1,512], index: 2, kind: input, shape index: {}]   ;;  %s2743_s3 = inlined_call_operand.hbm [shape: bf16[512,128], index: 3, kind: input, shape index: {}]   ;;  %s2744_s4 = inlined_call_operand.vmem [shape: f32[1,128], index: 4, kind: input, shape index: {}]   ;;  %s2745_s5 = inlined_call_operand.hbm [shape: f32[128,128], index: 5, kind: output, shape index: {}]  }
   0x1   :  { %12 = vsyncpa [#allocation3 + $0x1], 0 }
   0x2   :  { %13 = vsyncpa [#allocation6], 0 }
   0x3   :  { %14 = vsyncpa [#allocation4], 0 }
   0x4   :  { %16 = vsyncpa [#allocation4 + $0x1], 0  ;;  %s2068_s18 = smov 0   ;;  %s2070_s19 = smov 0  }
   0x5   :  { %s2072_s20 = smov 0   ;;  %s2074_s21 = smov 0  }
   0x6 LB: > { %s2089_s22 = sadd.s32 4294967295, %s2025_s21   ;;  %s1478_s23 = sadd.s32 4294967294, %s2025_s21   ;;  %s2025_s21 = sphi %s2074_s21, %s2776_s21   ;;  %s2021_s20 = sphi %s2072_s20, %s2775_s20   ;;  %s2017_s19 = sphi %s2070_s19, %s2774_s19   ;;  %s2013_s18 = sphi %s2068_s18, %s2773_s18  }
   0x7   : > { %p42_p0 = scmp.ne.s32.totalorder %s2017_s19, %s2013_s18  ;;  %p2746_p1 = scmp.eq.s32.totalorder %s2089_s22, 0 }
   0x8   : > { %p156_p3 = scmp.eq.s32.totalorder %s1478_s23, 1  ;;  %p1479_p5 = scmp.ge.s32.totalorder %s2025_s21, 1 }
   0x9   : > { %p2098_p4 = por %p2746_p1, %p42_p0  ;;  %p163_p7 = scmp.lt.s32.totalorder %s2025_s21, 3 }
   0xa   : > { %p2103_p6 = por %p156_p3, %p42_p0  ;;  %s2027_s27 = smov [#allocation5]  }
   0xb   : > { %s2752_s24 = scalar_select %p2098_p4, 1, 0 }
   0xc   : > { %s2753_s25 = scalar_select %p2103_p6, 1, 0 }
   0xd   : > { %p2108_p8 = pnand %p1479_p5, %p163_p7  ;;  %s175_s28 = sshll.u32 %s2027_s27, 4  ;;  %s2112_s28 = int_to_ptr.vmem [resolvable:$true] %s175_s28 }
   0xe   : > { %s2028_s30 = smov [#allocation7]   ;;  %s1869_s9 = scalar_lea.hbm %s2741_s1, 4096 }
   0xf   : > { %p1659_p9 = pneg %p2108_p8  ;;  %s191_s6 = sshll.u32 %s2028_s30, 4  ;;  %s2123_s6 = int_to_ptr.vmem [resolvable:$true] %s191_s6 }
  0x10   : > { %p1870_p12 = scmp.ne.s32.totalorder %s2741_s1, %s1869_s9  ;;  %p1876_p5 = scmp.lt.u32.totalorder %s1869_s9, %s2741_s1 }
  0x11   : > { %p2119_p11 = pnand %p1659_p9, %p2746_p1 }
  0x13   : > { %p1871_p13 = pneg %p2119_p11 }
  0x15   : > { %p1872_p0 = pnand %p1871_p13, %p1870_p12 }
  0x17   : > { %p1873_p3 = pneg %p1872_p0 }
  0x19   : > { %p1878_p7 = pnand %p1876_p5, %p1873_p3 }
  0x1b   : > { %1881 = shalt.err (!%p1878_p7)
}
  0x1c   : > { %s1882_s14 = scalar_lea.vmem %s2112_s28, 4096  ;;  %p1890_p2 = scmp.lt.s32.totalorder %s2112_s28, %s2112_s28 }
  0x1d   : > { %p1883_p9 = scmp.ne.s32.totalorder %s2112_s28, %s1882_s14  ;;  %p1891_p12 = scmp.lt.s32.totalorder %s1882_s14, %s1882_s14 }
  0x1f   : > { %p1885_p10 = pnand %p1883_p9, %p1871_p13  ;;  %p1892_p0 = por %p1891_p12, %p1890_p2 }
  0x21   : > { %p1886_p1 = pneg %p1885_p10 }
  0x23   : > { %p1893_p6 = pnand %p1892_p0, %p1886_p1 }
  0x25   : > { %1896 = shalt.err (!%p1893_p6)
}
  0x26   : > { %s2029_s15 = smov 256   ;;  %s2030_s16 = smov 16  }
  0x27   : > { %1662 = dma.hbm_to_vmem [thread:$0]  (!%p2119_p11), %s2741_s1, 4096, %s2112_s28, [#allocation6], %s2029_s15, %s2029_s15, %s2030_s16  }
  0x28   : > { %s1897_s7 = scalar_lea.hbm %s2743_s3, 4096 }
  0x29   : > { %p1898_p2 = scmp.ne.s32.totalorder %s2743_s3, %s1897_s7  ;;  %p1904_p10 = scmp.lt.u32.totalorder %s1897_s7, %s2743_s3 }
  0x2b   : > { %p1900_p1 = pnand %p1898_p2, %p1871_p13 }
  0x2d   : > { %p1901_p6 = pneg %p1900_p1 }
  0x2f   : > { %p1906_p3 = pnand %p1904_p10, %p1901_p6 }
  0x31   : > { %1909 = shalt.err (!%p1906_p3)
}
  0x32   : > { %s1910_s28 = scalar_lea.vmem %s2123_s6, 4096  ;;  %p1918_p12 = scmp.lt.s32.totalorder %s2123_s6, %s2123_s6 }
  0x33   : > { %p1911_p5 = scmp.ne.s32.totalorder %s2123_s6, %s1910_s28  ;;  %p1919_p0 = scmp.lt.s32.totalorder %s1910_s28, %s1910_s28 }
  0x35   : > { %p1913_p7 = pnand %p1911_p5, %p1871_p13  ;;  %p1920_p2 = por %p1919_p0, %p1918_p12 }
  0x37   : > { %p1914_p9 = pneg %p1913_p7 }
  0x39   : > { %p1921_p1 = pnand %p1920_p2, %p1914_p9 }
  0x3b   : > { %1924 = shalt.err (!%p1921_p1)
}
  0x3c   : > { %s2031_s12 = smov 64   ;;  %s2032_s13 = smov 4  }
  0x3d   : > { %1665 = dma.hbm_to_vmem [thread:$0]  (!%p2119_p11), %s2743_s3, 4096, %s2123_s6, [#allocation6], %s2031_s12, %s2031_s12, %s2032_s13  }
  0x3e   : > { %s2181_s16 = sadd.s32 1, %s2025_s21   ;;  %s29_s23 = sadd.s32 1, %s2021_s20 }
  0x3f   : > { %s26_s17 = ssub.s32 %s2025_s21, %s2181_s16  ;;  %p36_p6 = scmp.ne.s32.totalorder %s2021_s20, %s2017_s19 }
  0x40   : > { %p27_p13 = scmp.eq.s32.totalorder %s26_s17, 0  ;;  %p37_p10 = scmp.eq.s32.totalorder %s2025_s21, 0 }
  0x41   : > { %p2756_p5 = scmp.eq.s32.totalorder %s2089_s22, 1  ;;  %p1676_p9 = scmp.lt.s32.totalorder %s2025_s21, 2 }
  0x42   : > { %s2190_s27 = scalar_select %p27_p13, %s2021_s20, %s29_s23  }
  0x43   : > { %p38_p3 = por %p37_p10, %p36_p6  ;;  %p2194_p7 = por %p2756_p5, %p36_p6 }
  0x44   : > { %s208_s30 = sand.u32 1, %s2021_s20   ;;  %s1565_s6 = sshll.u32 %s2025_s21, 9 }
  0x45   : > { %s2757_s29 = scalar_select %p2194_p7, 1, 0 }
  0x46   : > { %s1483_s7 = sshll.u32 %s208_s30, 5  ;;  %s2204_s10 = scalar_lea.hbm %s2740_s0, %s1565_s6 }
  0x47   : > { %s212_s11 = scalar_lea.vmem [#allocation2], %s1483_s7  ;;  %p2208_p11 = pnand %p1676_p9, %p38_p3 }
  0x48   : > { %s219_s28 = sshll.u32 %s212_s11, 4  ;;  %s2212_s15 = scalar_lea.sflag [#allocation3], %s208_s30  ;;  %s2206_s28 = int_to_ptr.vmem [resolvable:$true] %s219_s28 }
  0x49   : > { %s1925_s17 = scalar_lea.hbm %s2204_s10, 512  ;;  %p1927_p0 = pneg %p2208_p11 }
  0x4a   : > { %p1926_p12 = scmp.ne.s32.totalorder %s2204_s10, %s1925_s17  ;;  %s1930_s6 = scalar_lea.hbm %s2740_s0, 1024 }
  0x4b   : > { %p1931_p13 = scmp.lt.u32.totalorder %s2204_s10, %s2740_s0  ;;  %p1932_p6 = scmp.lt.u32.totalorder %s1930_s6, %s1925_s17 }
  0x4c   : > { %p1928_p2 = pnand %p1927_p0, %p1926_p12  ;;  %p1934_p3 = scmp.lt.u32.totalorder %s1925_s17, %s2204_s10 }
  0x4d   : > { %p1933_p10 = por %p1932_p6, %p1931_p13 }
  0x4e   : > { %p1929_p1 = pneg %p1928_p2 }
  0x4f   : > { %p1935_p5 = por %p1934_p3, %p1933_p10 }
  0x51   : > { %p1936_p9 = pnand %p1935_p5, %p1929_p1 }
  0x53   : > { %1939 = shalt.err (!%p1936_p9)
}
  0x54   : > { %s1940_s30 = scalar_lea.vmem %s2206_s28, 512  ;;  %s2033_s11 = smov [#allocation2]  }
  0x55   : > { %p1941_p12 = scmp.ne.s32.totalorder %s2206_s28, %s1940_s30  ;;  %s1945_s23 = sshll.u32 %s2033_s11, 4  ;;  %s1946_s23 = int_to_ptr.vmem [resolvable:$false] %s1945_s23 }
  0x56   : > { %s1947_s7 = scalar_lea.vmem %s1946_s23, 1024  ;;  %p1948_p4 = scmp.lt.s32.totalorder %s2206_s28, %s1946_s23 }
  0x57   : > { %p1943_p2 = pnand %p1941_p12, %p1927_p0  ;;  %p1949_p13 = scmp.lt.s32.totalorder %s1947_s7, %s1940_s30 }
  0x59   : > { %p1944_p7 = pneg %p1943_p2  ;;  %p1950_p6 = por %p1949_p13, %p1948_p4 }
  0x5b   : > { %p1951_p10 = pnand %p1950_p6, %p1944_p7 }
  0x5d   : > { %1954 = shalt.err (!%p1951_p10)
}
  0x5e   : > { %1669 = dma.hbm_to_vmem [thread:$0]  (!%p2208_p11), %s2204_s10, 512, %s2206_s28, %s2212_s15, %s2031_s12, %s2031_s12, %s2032_s13  }
  0x5f   : > { %231 = sbr.rel (%p2108_p8) target bundleno = 683 (0x2ab), region = 40 }
  0x66   : > { %s2246_s17 = sand.u32 1, %s2017_s19   ;;  %p2759_p4 = scmp.ne.s32.totalorder %s2752_s24, 0 }
  0x67   : > { %s1487_s6 = sshll.u32 %s2246_s17, 5  ;;  %s234_s8 = scalar_lea.sflag [#allocation3], %s2246_s17 }
  0x68   : > { %s2250_s9 = scalar_lea.vmem [#allocation2], %s1487_s6 }
  0x69   : > { %2000 = dma.done.wait (%p2759_p4), %s234_s8, 512  }
  0x6a   : > { %2002 = vsyncadd (%p2759_p4), %s234_s8, 4294966784  ;;  %p2760_p7 = scmp.eq.s32.totalorder %s2089_s22, 0 }
  0x6c   : > { %2004 = dma.done.wait (%p2760_p7), [#allocation6], 8192   ;;  %p2761_p8 = pmov %p2760_p7 }
  0x6d   : > { %v2034_v0 = vmov 0   ;;  %v1721_v1 = vld [vmem:[#allocation5 + $0x4] ss:$16 sps:$4 sm:$0xff]   ;;  %v1723_v2 = vld [vmem:[#allocation5 + $0xc] ss:$16 sps:$4 sm:$0xff]   ;;  %s1490_s10 = sshll.u32 %s2246_s17, 6 }
  0x6e   : > { %2006 = vsyncadd (%p2761_p8), [#allocation6], 4294959104  ;;  %553 = vmatprep.mubr.bf16.mxu0 %v2034_v0  ;;  %626 = vmatprep.mubr.bf16.mxu1 %v2034_v0  ;;  %v1725_v3 = vld [vmem:[#allocation5] ss:$16 sps:$4 sm:$0xff]   ;;  %v1726_v4 = vld [vmem:[#allocation5 + $0x8] ss:$16 sps:$4 sm:$0xff]  }
  0x6f   : > { %521 = vmatprep.subr.bf16.mxu0 %v1721_v1  ;;  %594 = vmatprep.subr.bf16.mxu1 %v1723_v2  ;;  %v1727_v5 = vld [vmem:[#allocation5 + $0x24] ss:$16 sps:$4 sm:$0xff]   ;;  %v1729_v6 = vld [vmem:[#allocation5 + $0x2c] ss:$16 sps:$4 sm:$0xff]   ;;  %v1731_v7 = vld [vmem:[#allocation5 + $0x20] ss:$16 sps:$4 sm:$0xff]  }
  0x70   : > { %522 = vmatpush1.bf16.msra.mxu0 %v1725_v3  ;;  %595 = vmatpush1.bf16.msra.mxu1 %v1726_v4  ;;  %v1732_v8 = vld [vmem:[#allocation5 + $0x28] ss:$16 sps:$4 sm:$0xff]   ;;  %v1733_v9 = vld [vmem:[#allocation5 + $0x44] ss:$16 sps:$4 sm:$0xff]   ;;  %v1735_v10 = vld [vmem:[#allocation5 + $0x4c] ss:$16 sps:$4 sm:$0xff]  }
  0x71   : > { %523 = vmatprep.subr.bf16.mxu0 %v1727_v5  ;;  %596 = vmatprep.subr.bf16.mxu1 %v1729_v6  ;;  %v1737_v11 = vld [vmem:[#allocation5 + $0x40] ss:$16 sps:$4 sm:$0xff]   ;;  %v1738_v12 = vld [vmem:[#allocation5 + $0x48] ss:$16 sps:$4 sm:$0xff]   ;;  %v1739_v13 = vld [vmem:[#allocation5 + $0x64] ss:$16 sps:$4 sm:$0xff]   ;;  %v317_v5 = vlaneseq }
  0x72   : > { %v1741_v14 = vld [vmem:[#allocation5 + $0x6c] ss:$16 sps:$4 sm:$0xff]   ;;  %v1743_v15 = vld [vmem:[#allocation5 + $0x60] ss:$16 sps:$4 sm:$0xff]   ;;  %v1744_v16 = vld [vmem:[#allocation5 + $0x68] ss:$16 sps:$4 sm:$0xff]  }
  0x73   : > { %v1745_v17 = vld [vmem:[#allocation5 + $0x84] ss:$16 sps:$4 sm:$0xff]   ;;  %v1747_v18 = vld [vmem:[#allocation5 + $0x8c] ss:$16 sps:$4 sm:$0xff]   ;;  %v1749_v19 = vld [vmem:[#allocation5 + $0x80] ss:$16 sps:$4 sm:$0xff]  }
  0x74   : > { %524 = vmatpush1.bf16.msra.mxu0 %v1731_v7  ;;  %597 = vmatpush1.bf16.msra.mxu1 %v1732_v8  ;;  %v1750_v20 = vld [vmem:[#allocation5 + $0x88] ss:$16 sps:$4 sm:$0xff]   ;;  %v1751_v21 = vld [vmem:[#allocation5 + $0xa4] ss:$16 sps:$4 sm:$0xff]   ;;  %v1753_v22 = vld [vmem:[#allocation5 + $0xac] ss:$16 sps:$4 sm:$0xff]  }
  0x75   : > { %525 = vmatprep.subr.bf16.mxu0 %v1733_v9  ;;  %598 = vmatprep.subr.bf16.mxu1 %v1735_v10  ;;  %v1755_v23 = vld [vmem:[#allocation5 + $0xa0] ss:$16 sps:$4 sm:$0xff]   ;;  %v1756_v24 = vld [vmem:[#allocation5 + $0xa8] ss:$16 sps:$4 sm:$0xff]   ;;  %v1757_v25 = vld [vmem:[#allocation5 + $0xc4] ss:$16 sps:$4 sm:$0xff]  }
  0x76   : > { %v1759_v26 = vld [vmem:[#allocation5 + $0xcc] ss:$16 sps:$4 sm:$0xff]   ;;  %v1761_v27 = vld [vmem:[#allocation5 + $0xc0] ss:$16 sps:$4 sm:$0xff]   ;;  %v1762_v28 = vld [vmem:[#allocation5 + $0xc8] ss:$16 sps:$4 sm:$0xff]  }
  0x77   : > { %v1763_v29 = vld [vmem:[#allocation5 + $0xe4] ss:$16 sps:$4 sm:$0xff]   ;;  %v1765_v30 = vld [vmem:[#allocation5 + $0xec] ss:$16 sps:$4 sm:$0xff]   ;;  %v1767_v31 = vld [vmem:[#allocation5 + $0xe0] ss:$16 sps:$4 sm:$0xff]  }
  0x78   : > { %526 = vmatpush1.bf16.msra.mxu0 %v1737_v11  ;;  %599 = vmatpush1.bf16.msra.mxu1 %v1738_v12  ;;  %v1768_v32 = vld [vmem:[#allocation5 + $0xe8] ss:$16 sps:$4 sm:$0xff]   ;;  %v1769_v33 = vld [vmem:[%s2250_s9] sm:$0xff]   ;;  %v1771_v35 = vld [vmem:[%s2250_s9 + $0x10] sm:$0xff]   ;;  %v318_v6 = vshrl.u32 %v317_v5, 7  ;;  %s2673_s28 = scalar_lea.vmem [#allocation8], %s1490_s10 }
  0x79   : > { %527 = vmatprep.subr.bf16.mxu0 %v1739_v13  ;;  %600 = vmatprep.subr.bf16.mxu1 %v1741_v14  ;;  %v1770_v34 = vld [vmem:[%s2250_s9 + $0x8] sm:$0xff]   ;;  %v1772_v36 = vld [vmem:[%s2250_s9 + $0x18] sm:$0xff]   ;;  %v1773_v37 = vld [vmem:[#allocation7 + $0x40] sm:$0xff]   ;;  %s1386_s14 = sshll.u32 %s2673_s28, 4  ;;  %s1566_s15 = sshll.u32 %s2089_s22, 10  ;;  %s2689_s14 = int_to_ptr.vmem [resolvable:$true] %s1386_s14 }
  0x7a   : > { %v1775_v38 = vld [vmem:[#allocation7 + $0xc0] sm:$0xff]   ;;  %v1777_v41 = vld [vmem:[#allocation7 + $0x48] sm:$0xff]   ;;  %v1781_v45 = vld [vmem:[#allocation7 + $0x50] sm:$0xff]   ;;  %v319_v7 = vsub.s32 0, %v318_v6  ;;  %v327_v8 = vsub.s32 2, %v318_v6  ;;  %v323_v10 = vsub.s32 1, %v318_v6  ;;  %s2694_s23 = scalar_lea.hbm %s2745_s5, %s1566_s15 }
  0x7b   : > { %v1774_v39 = vld [vmem:[#allocation7] sm:$0xff]   ;;  %v1779_v42 = vld [vmem:[#allocation7 + $0xc8] sm:$0xff]   ;;  %v1783_v46 = vld [vmem:[#allocation7 + $0xd0] sm:$0xff]   ;;  %v331_v11 = vsub.s32 3, %v318_v6  ;;  %s1373_s7 = scalar_lea.sflag [#allocation4], %s2246_s17  ;;  %s1955_s6 = scalar_lea.vmem %s2689_s14, 1024 }
  0x7c   : > { %528 = vmatpush1.bf16.msra.mxu0 %v1743_v15  ;;  %601 = vmatpush1.bf16.msra.mxu1 %v1744_v16  ;;  %v1776_v40 = vld [vmem:[#allocation7 + $0x80] sm:$0xff]   ;;  %v1778_v43 = vld [vmem:[#allocation7 + $0x8] sm:$0xff]   ;;  %v1782_v47 = vld [vmem:[#allocation7 + $0x10] sm:$0xff]   ;;  %p1956_p11 = scmp.ne.s32.totalorder %s2689_s14, %s1955_s6  ;;  %p2770_p0 = scmp.ne.s32.totalorder %s2757_s29, 0 }
  0x7d   : > { %529 = vmatprep.subr.bf16.mxu0 %v1745_v17  ;;  %602 = vmatprep.subr.bf16.mxu1 %v1747_v18  ;;  %v1780_v44 = vld [vmem:[#allocation7 + $0x88] sm:$0xff]   ;;  %v1784_v48 = vld [vmem:[#allocation7 + $0x90] sm:$0xff]   ;;  %v1785_v49 = vld [vmem:[#allocation7 + $0x58] sm:$0xff]   ;;  %s2035_s22 = smov [#allocation8]  }
  0x7e   : > { %v1787_v50 = vld [vmem:[#allocation7 + $0xd8] sm:$0xff]   ;;  %v1789_v53 = vld [vmem:[#allocation7 + $0x60] sm:$0xff]   ;;  %v1793_v57 = vld [vmem:[#allocation7 + $0x68] sm:$0xff]   ;;  %p1957_p1 = pnand %p1956_p11, %p2770_p0  ;;  %s1959_s8 = sshll.u32 %s2035_s22, 4  ;;  %s1960_s8 = int_to_ptr.vmem [resolvable:$false] %s1959_s8 }
  0x7f   : > { %v1786_v51 = vld [vmem:[#allocation7 + $0x18] sm:$0xff]   ;;  %v1791_v54 = vld [vmem:[#allocation7 + $0xe0] sm:$0xff]   ;;  %v1795_v58 = vld [vmem:[#allocation7 + $0xe8] sm:$0xff]   ;;  %s1961_s9 = scalar_lea.vmem %s1960_s8, 2048  ;;  %p1962_p5 = scmp.lt.s32.totalorder %s2689_s14, %s1960_s8 }
  0x80   : > { %530 = vmatpush1.bf16.msra.mxu0 %v1749_v19  ;;  %603 = vmatpush1.bf16.msra.mxu1 %v1750_v20  ;;  %v1788_v52 = vld [vmem:[#allocation7 + $0x98] sm:$0xff]   ;;  %v1790_v55 = vld [vmem:[#allocation7 + $0x20] sm:$0xff]   ;;  %v1794_v59 = vld [vmem:[#allocation7 + $0x28] sm:$0xff]   ;;  %p1958_p3 = pneg %p1957_p1  ;;  %p1963_p9 = scmp.lt.s32.totalorder %s1961_s9, %s1955_s6 }
  0x81   : > { %531 = vmatprep.subr.bf16.mxu0 %v1751_v21  ;;  %604 = vmatprep.subr.bf16.mxu1 %v1753_v22  ;;  %v1792_v56 = vld [vmem:[#allocation7 + $0xa0] sm:$0xff]   ;;  %v1796_v60 = vld [vmem:[#allocation7 + $0xa8] sm:$0xff]   ;;  %v1797_v61 = vld [vmem:[#allocation7 + $0x70] sm:$0xff]  }
  0x82   : > { %v1799_v62 = vld [vmem:[#allocation7 + $0xf0] sm:$0xff]   ;;  %v1801_v1 = vld [vmem:[#allocation7 + $0x78] sm:$0xff]   ;;  %v315_v9 = vld [vmem:[%s2742_s2] sm:$0xf]  ;;  %p1964_p12 = por %p1963_p9, %p1962_p5 }
  0x83   : > { %v1798_v63 = vld [vmem:[#allocation7 + $0x30] sm:$0xff]   ;;  %v1803_v2 = vld [vmem:[#allocation7 + $0xf8] sm:$0xff]   ;;  %v2275_v12 = vrot.slane %v315_v9, %v319_v7  ;;  %v2277_v13 = vrot.slane %v315_v9, %v327_v8  ;;  %v2279_v14 = vrot.slane %v315_v9, %v323_v10  ;;  %v2281_v15 = vrot.slane %v315_v9, %v331_v11 }
  0x84   : > { %532 = vmatpush1.bf16.msra.mxu0 %v1755_v23  ;;  %605 = vmatpush1.bf16.msra.mxu1 %v1756_v24  ;;  %v1802_v3 = vld [vmem:[#allocation7 + $0x38] sm:$0xff]   ;;  %p1965_p2 = pnand %p1964_p12, %p1958_p3 }
  0x85   : > { %533 = vmatprep.subr.bf16.mxu0 %v1757_v25  ;;  %606 = vmatprep.subr.bf16.mxu1 %v1759_v26  ;;  %v1804_v4 = vld [vmem:[#allocation7 + $0xb8] sm:$0xff]  }
  0x88   : > { %534 = vmatpush1.bf16.msra.mxu0 %v1761_v27  ;;  %607 = vmatpush1.bf16.msra.mxu1 %v1762_v28 }
  0x89   : > { %535 = vmatprep.subr.bf16.mxu0 %v1763_v29  ;;  %608 = vmatprep.subr.bf16.mxu1 %v1765_v30 }
  0x8c   : > { %536 = vmatpush1.bf16.msra.mxu0 %v1767_v31  ;;  %609 = vmatpush1.bf16.msra.mxu1 %v1768_v32 }
  0x8d   : > { %1567 = vmatprep.subr.bf16.mxu0 %v1773_v37  ;;  %1607 = vmatprep.subr.bf16.mxu1 %v1775_v38 }
  0x8f   : > { %554 = vmatmul.mubr.bf16.vlgmr.msra.gmra.mrb[0].mxu0 %v1769_v33  ;;  %627 = vmatmul.mubr.bf16.vlgmr.msra.gmra.mrb[0].mxu1 %v1769_v33 }
  0x90   : > { %563 = vmatprep.mubr.bf16.mxu0 %v2034_v0  ;;  %636 = vmatprep.mubr.bf16.mxu1 %v2034_v0 }
  0x91   : > { %1568 = vmatpush3.bf16.msra.mxu0 %v1774_v39  ;;  %1608 = vmatpush3.bf16.msra.mxu1 %v1776_v40 }
  0x92   : > { %1569 = vmatprep.subr.bf16.mxu0 %v1777_v41  ;;  %1609 = vmatprep.subr.bf16.mxu1 %v1779_v42 }
  0x95   : > { %1570 = vmatpush3.bf16.msra.mxu0 %v1778_v43  ;;  %1610 = vmatpush3.bf16.msra.mxu1 %v1780_v44 }
  0x96   : > { %1571 = vmatprep.subr.bf16.mxu0 %v1781_v45  ;;  %1611 = vmatprep.subr.bf16.mxu1 %v1783_v46 }
  0x97   : > { %564 = vmatmul.mubr.bf16.gmra.mrb[4].mxu0 %v1770_v34  ;;  %637 = vmatmul.mubr.bf16.gmra.mrb[4].mxu1 %v1770_v34 }
  0x98   : > { %573 = vmatprep.mubr.bf16.mxu0 %v2034_v0  ;;  %646 = vmatprep.mubr.bf16.mxu1 %v2034_v0 }
  0x99   : > { %1572 = vmatpush3.bf16.msra.mxu0 %v1782_v47  ;;  %1612 = vmatpush3.bf16.msra.mxu1 %v1784_v48 }
  0x9a   : > { %1573 = vmatprep.subr.bf16.mxu0 %v1785_v49  ;;  %1613 = vmatprep.subr.bf16.mxu1 %v1787_v50 }
  0x9d   : > { %1574 = vmatpush3.bf16.msra.mxu0 %v1786_v51  ;;  %1614 = vmatpush3.bf16.msra.mxu1 %v1788_v52 }
  0x9e   : > { %1575 = vmatprep.subr.bf16.mxu0 %v1789_v53  ;;  %1615 = vmatprep.subr.bf16.mxu1 %v1791_v54 }
  0x9f   : > { %574 = vmatmul.mubr.bf16.gmra.mrb[8].mxu0 %v1771_v35  ;;  %647 = vmatmul.mubr.bf16.gmra.mrb[8].mxu1 %v1771_v35 }
  0xa0   : > { %583 = vmatprep.mubr.bf16.mxu0 %v2034_v0  ;;  %656 = vmatprep.mubr.bf16.mxu1 %v2034_v0  ;;  %v1800_v0 = vld [vmem:[#allocation7 + $0xb0] sm:$0xff]  }
  0xa1   : > { %1576 = vmatpush3.bf16.msra.mxu0 %v1790_v55  ;;  %1616 = vmatpush3.bf16.msra.mxu1 %v1792_v56 }
  0xa2   : > { %1577 = vmatprep.subr.bf16.mxu0 %v1793_v57  ;;  %1617 = vmatprep.subr.bf16.mxu1 %v1795_v58 }
  0xa5   : > { %1578 = vmatpush3.bf16.msra.mxu0 %v1794_v59  ;;  %1618 = vmatpush3.bf16.msra.mxu1 %v1796_v60 }
  0xa6   : > { %1579 = vmatprep.subr.bf16.mxu0 %v1797_v61  ;;  %1619 = vmatprep.subr.bf16.mxu1 %v1799_v62 }
  0xa7   : > { %584 = vmatmul.mubr.bf16.gmra.mrb[12].mxu0 %v1772_v36  ;;  %657 = vmatmul.mubr.bf16.gmra.mrb[12].mxu1 %v1772_v36 }
  0xa9   : > { %1580 = vmatpush3.bf16.msra.mxu0 %v1798_v63  ;;  %1620 = vmatpush3.bf16.msra.mxu1 %v1800_v0 }
  0xaa   : > { %1581 = vmatprep.subr.bf16.mxu0 %v1801_v1  ;;  %1621 = vmatprep.subr.bf16.mxu1 %v1803_v2 }
  0xad   : > { %1582 = vmatpush3.bf16.msra.mxu0 %v1802_v3  ;;  %1622 = vmatpush3.bf16.msra.mxu1 %v1804_v4 }
 0x162   : > { %v555_v16 = vpop.f32.mrb[0].mxu0  ;;  %v628_v17 = vpop.f32.mrb[0].mxu1 }
 0x163   : > { %v2284_v18 = vadd.f32 %v555_v16, %v2275_v12  ;;  %v2287_v19 = vadd.f32 %v628_v17, %v2277_v13  ;;  %v557_v20 = vpop.f32.mrb[1].mxu0  ;;  %v630_v21 = vpop.f32.mrb[1].mxu1 }
 0x164   : > { %v2290_v22 = vadd.f32 %v557_v20, %v2279_v14  ;;  %v2293_v23 = vadd.f32 %v630_v21, %v2281_v15  ;;  %v559_v24 = vpop.f32.mrb[2].mxu0  ;;  %v632_v25 = vpop.f32.mrb[2].mxu1 }
 0x165   : > { %v667_v26 = vmul.f32 %v2284_v18, %v2284_v18  ;;  %v669_v27 = vmul.f32 %v2287_v19, %v2287_v19  ;;  %v2300_v28 = vadd.f32 %v559_v24, %v2275_v12  ;;  %v2303_v29 = vadd.f32 %v632_v25, %v2277_v13  ;;  %v561_v30 = vpop.f32.mrb[3].mxu0  ;;  %v634_v31 = vpop.f32.mrb[3].mxu1 }
 0x166   : > { %v668_v32 = vmul.f32 %v2290_v22, %v2290_v22  ;;  %v670_v33 = vmul.f32 %v2293_v23, %v2293_v23  ;;  %v2310_v34 = vadd.f32 %v561_v30, %v2279_v14  ;;  %v2313_v35 = vadd.f32 %v634_v31, %v2281_v15 }
 0x167   : > { %v699_v36 = vmul.f32 %v667_v26, %v2284_v18  ;;  %v701_v37 = vmul.f32 %v669_v27, %v2287_v19  ;;  %v671_v38 = vmul.f32 %v2300_v28, %v2300_v28  ;;  %v673_v39 = vmul.f32 %v2303_v29, %v2303_v29 }
 0x168   : > { %v700_v40 = vmul.f32 %v668_v32, %v2290_v22  ;;  %v702_v41 = vmul.f32 %v670_v33, %v2293_v23  ;;  %v672_v42 = vmul.f32 %v2310_v34, %v2310_v34  ;;  %v674_v43 = vmul.f32 %v2313_v35, %v2313_v35 }
 0x169   : > { %v731_v44 = vmul.f32 0.044715, %v699_v36  ;;  %v733_v45 = vmul.f32 0.044715, %v701_v37  ;;  %v703_v46 = vmul.f32 %v671_v38, %v2300_v28  ;;  %v705_v47 = vmul.f32 %v673_v39, %v2303_v29 }
 0x16a   : > { %v732_v48 = vmul.f32 0.044715, %v700_v40  ;;  %v734_v49 = vmul.f32 0.044715, %v702_v41  ;;  %v704_v50 = vmul.f32 %v672_v42, %v2310_v34  ;;  %v706_v51 = vmul.f32 %v674_v43, %v2313_v35  ;;  %v565_v52 = vpop.f32.mrb[4].mxu0  ;;  %v638_v53 = vpop.f32.mrb[4].mxu1 }
 0x16b   : > { %v763_v54 = vadd.f32 %v731_v44, %v2284_v18  ;;  %v765_v55 = vadd.f32 %v733_v45, %v2287_v19  ;;  %v735_v56 = vmul.f32 0.044715, %v703_v46  ;;  %v737_v57 = vmul.f32 0.044715, %v705_v47  ;;  %v567_v58 = vpop.f32.mrb[5].mxu0  ;;  %v640_v59 = vpop.f32.mrb[5].mxu1 }
 0x16c   : > { %v764_v60 = vadd.f32 %v732_v48, %v2290_v22  ;;  %v766_v61 = vadd.f32 %v734_v49, %v2293_v23  ;;  %v736_v62 = vmul.f32 0.044715, %v704_v50  ;;  %v738_v63 = vmul.f32 0.044715, %v706_v51  ;;  %v569_v0 = vpop.f32.mrb[6].mxu0  ;;  %v642_v1 = vpop.f32.mrb[6].mxu1 }
 0x16d   : > { %v795_v2 = vmul.f32 0.7978846, %v763_v54  ;;  %v797_v3 = vmul.f32 0.7978846, %v765_v55  ;;  %v767_v4 = vadd.f32 %v735_v56, %v2300_v28  ;;  %v769_v5 = vadd.f32 %v737_v57, %v2303_v29  ;;  %v571_v6 = vpop.f32.mrb[7].mxu0  ;;  %v644_v7 = vpop.f32.mrb[7].mxu1 }
 0x16e   : > { %v796_v8 = vmul.f32 0.7978846, %v764_v60  ;;  %v798_v9 = vmul.f32 0.7978846, %v766_v61  ;;  %v768_v10 = vadd.f32 %v736_v62, %v2310_v34  ;;  %v770_v11 = vadd.f32 %v738_v63, %v2313_v35 }
 0x16f   : > { %1805 = vtanh.f32 %v795_v2  ;;  %v799_v16 = vmul.f32 0.7978846, %v767_v4  ;;  %v801_v17 = vmul.f32 0.7978846, %v769_v5  ;;  %v2340_v20 = vadd.f32 %v565_v52, %v2275_v12 }
 0x170   : > { %1807 = vtanh.f32 %v797_v3  ;;  %v800_v21 = vmul.f32 0.7978846, %v768_v10  ;;  %v802_v24 = vmul.f32 0.7978846, %v770_v11  ;;  %v2343_v25 = vadd.f32 %v638_v53, %v2277_v13 }
 0x171   : > { %1809 = vtanh.f32 %v796_v8  ;;  %v675_v26 = vmul.f32 %v2340_v20, %v2340_v20  ;;  %v2348_v27 = vadd.f32 %v567_v58, %v2279_v14  ;;  %v2351_v30 = vadd.f32 %v640_v59, %v2281_v15 }
 0x172   : > { %1811 = vtanh.f32 %v798_v9  ;;  %v677_v31 = vmul.f32 %v2343_v25, %v2343_v25  ;;  %v2356_v32 = vadd.f32 %v569_v0, %v2275_v12  ;;  %v2359_v33 = vadd.f32 %v642_v1, %v2277_v13  ;;  %v2361_v36 = vpop.f32.mrb[8].mxu0  ;;  %v2363_v37 = vpop.f32.mrb[8].mxu1 }
 0x173   : > { %1813 = vtanh.f32 %v799_v16  ;;  %v707_v38 = vmul.f32 %v675_v26, %v2340_v20  ;;  %v676_v39 = vmul.f32 %v2348_v27, %v2348_v27  ;;  %v678_v40 = vmul.f32 %v2351_v30, %v2351_v30  ;;  %v2370_v41 = vpop.f32.mrb[9].mxu0  ;;  %v2372_v42 = vpop.f32.mrb[9].mxu1 }
 0x174   : > { %1815 = vtanh.f32 %v801_v17  ;;  %v709_v43 = vmul.f32 %v677_v31, %v2343_v25  ;;  %v679_v44 = vmul.f32 %v2356_v32, %v2356_v32  ;;  %v681_v45 = vmul.f32 %v2359_v33, %v2359_v33  ;;  %v2379_v46 = vpop.f32.mrb[10].mxu0  ;;  %v2381_v47 = vpop.f32.mrb[10].mxu1 }
 0x175   : > { %1817 = vtanh.f32 %v800_v21  ;;  %v739_v48 = vmul.f32 0.044715, %v707_v38  ;;  %v708_v49 = vmul.f32 %v676_v39, %v2348_v27  ;;  %v710_v50 = vmul.f32 %v678_v40, %v2351_v30  ;;  %v2385_v51 = vpop.f32.mrb[11].mxu0  ;;  %v2387_v52 = vpop.f32.mrb[11].mxu1 }
 0x176   : > { %1819 = vtanh.f32 %v802_v24  ;;  %v741_v53 = vmul.f32 0.044715, %v709_v43  ;;  %v711_v54 = vmul.f32 %v679_v44, %v2356_v32  ;;  %v713_v55 = vmul.f32 %v681_v45, %v2359_v33 }
 0x177   : > { %v771_v56 = vadd.f32 %v739_v48, %v2340_v20  ;;  %v740_v57 = vmul.f32 0.044715, %v708_v49  ;;  %v742_v58 = vmul.f32 0.044715, %v710_v50  ;;  %v2393_v59 = vadd.f32 %v571_v6, %v2279_v14 }
 0x178   : > { %v773_v60 = vadd.f32 %v741_v53, %v2343_v25  ;;  %v743_v61 = vmul.f32 0.044715, %v711_v54  ;;  %v745_v62 = vmul.f32 0.044715, %v713_v55  ;;  %v2397_v63 = vadd.f32 %v644_v7, %v2281_v15 }
 0x179   : > { %v1806_v0 = vpop.eup %1805  ;;  %v803_v1 = vmul.f32 0.7978846, %v771_v56  ;;  %v772_v2 = vadd.f32 %v740_v57, %v2348_v27  ;;  %v774_v3 = vadd.f32 %v742_v58, %v2351_v30  ;;  %v680_v4 = vmul.f32 %v2393_v59, %v2393_v59 }
 0x17a   : > { %v1808_v5 = vpop.eup %1807  ;;  %v859_v8 = vadd.f32 1.0, %v1806_v0  ;;  %v805_v6 = vmul.f32 0.7978846, %v773_v60  ;;  %v775_v9 = vadd.f32 %v743_v61, %v2356_v32  ;;  %v777_v10 = vadd.f32 %v745_v62, %v2359_v33  ;;  %v2405_v11 = vpop.f32.mrb[12].mxu0 }
 0x17b   : > { %v2407_v7 = vpop.f32.mrb[12].mxu1  ;;  %v2409_v16 = vpop.eup %1809  ;;  %v861_v17 = vadd.f32 1.0, %v1808_v5  ;;  %1821 = vtanh.f32 %v803_v1  ;;  %v804_v21 = vmul.f32 0.7978846, %v772_v2  ;;  %v806_v24 = vmul.f32 0.7978846, %v774_v3 }
 0x17c   : > { %v2411_v26 = vpop.f32.mrb[13].mxu0  ;;  %v2413_v31 = vpop.eup %1811  ;;  %v891_v38 = vmul.f32 0.5, %v859_v8  ;;  %1823 = vtanh.f32 %v805_v6  ;;  %v807_v39 = vmul.f32 0.7978846, %v775_v9  ;;  %v809_v40 = vmul.f32 0.7978846, %v777_v10 }
 0x17d   : > { %v2415_v43 = vpop.f32.mrb[13].mxu1  ;;  %v1814_v44 = vpop.eup %1813  ;;  %v893_v45 = vmul.f32 0.5, %v861_v17  ;;  %1825 = vtanh.f32 %v804_v21  ;;  %v712_v48 = vmul.f32 %v680_v4, %v2393_v59  ;;  %v682_v49 = vmul.f32 %v2397_v63, %v2397_v63 }
 0x17e   : > { %v2420_v50 = vpop.f32.mrb[14].mxu0  ;;  %v2422_v53 = vpop.f32.mrb[14].mxu1  ;;  %v2425_v55 = vmul.f32 %v891_v38, %v2284_v18  ;;  %v863_v56 = vadd.f32 1.0, %v1814_v44  ;;  %1827 = vtanh.f32 %v806_v24  ;;  %v2429_v57 = vadd.f32 %v2361_v36, %v2275_v12 }
 0x17f   : > { %v1816_v54 = vpop.eup %1815  ;;  %v2431_v58 = vpop.f32.mrb[15].mxu0  ;;  %v2438_v62 = vmul.f32 %v893_v45, %v2287_v19  ;;  %1829 = vtanh.f32 %v807_v39  ;;  %v744_v1 = vmul.f32 0.044715, %v712_v48  ;;  %v714_v3 = vmul.f32 %v682_v49, %v2397_v63 }
 0x180   : > { %v2433_v60 = vpop.f32.mrb[15].mxu1  ;;  %v2435_v61 = vpop.eup %1817  ;;  %v865_v0 = vadd.f32 1.0, %v1816_v54  ;;  %v895_v2 = vmul.f32 0.5, %v863_v56  ;;  %1831 = vtanh.f32 %v809_v40  ;;  %v683_v36 = vmul.f32 %v2429_v57, %v2429_v57 }
 0x181   : > { %v2440_v18 = vpop.eup %1819  ;;  %v776_v5 = vadd.f32 %v744_v1, %v2393_v59  ;;  %v2448_v8 = vadd.f32 %v2363_v37, %v2277_v13  ;;  %v2452_v19 = vadd.f32 %v2370_v41, %v2279_v14  ;;  %v746_v9 = vmul.f32 0.044715, %v714_v3 }
 0x182   : > { %v897_v4 = vmul.f32 0.5, %v865_v0  ;;  %v2455_v6 = vmul.f32 %v895_v2, %v2300_v28  ;;  %v715_v10 = vmul.f32 %v683_v36, %v2429_v57  ;;  %v2460_v17 = vadd.f32 %v2372_v42, %v2281_v15 }
 0x183   : > { %v808_v24 = vmul.f32 0.7978846, %v776_v5  ;;  %v685_v37 = vmul.f32 %v2448_v8, %v2448_v8  ;;  %v684_v41 = vmul.f32 %v2452_v19, %v2452_v19  ;;  %v778_v38 = vadd.f32 %v746_v9, %v2397_v63 }
 0x184   : > { %v2463_v21 = vmul.f32 %v897_v4, %v2303_v29  ;;  %v747_v39 = vmul.f32 0.044715, %v715_v10  ;;  %v686_v42 = vmul.f32 %v2460_v17, %v2460_v17  ;;  %v2486_v0 = vadd.f32 %v2379_v46, %v2275_v12 }
 0x185   : > { %v2474_v40 = vpop.eup %1821  ;;  %1833 = vtanh.f32 %v808_v24  ;;  %v717_v44 = vmul.f32 %v685_v37, %v2448_v8  ;;  %v716_v45 = vmul.f32 %v684_v41, %v2452_v19  ;;  %v810_v49 = vmul.f32 0.7978846, %v778_v38 }
 0x186   : > { %v2480_v48 = vpop.eup %1823  ;;  %v779_v54 = vadd.f32 %v747_v39, %v2429_v57  ;;  %v718_v56 = vmul.f32 %v686_v42, %v2460_v17  ;;  %v2492_v36 = vadd.f32 %v2381_v47, %v2277_v13  ;;  %v2496_v4 = vadd.f32 %v2385_v51, %v2279_v14 }
 0x187   : > { %v2488_v1 = vpop.eup %1825  ;;  %v749_v2 = vmul.f32 0.044715, %v717_v44  ;;  %v748_v3 = vmul.f32 0.044715, %v716_v45  ;;  %1835 = vtanh.f32 %v810_v49  ;;  %v687_v46 = vmul.f32 %v2486_v0, %v2486_v0 }
 0x188   : > { %v2498_v5 = vpop.eup %1827  ;;  %v811_v9 = vmul.f32 0.7978846, %v779_v54  ;;  %v750_v10 = vmul.f32 0.044715, %v718_v56  ;;  %v689_v47 = vmul.f32 %v2492_v36, %v2492_v36  ;;  %v688_v51 = vmul.f32 %v2496_v4, %v2496_v4 }
 0x189   : > { %v2502_v24 = vpop.eup %1829  ;;  %v781_v37 = vadd.f32 %v749_v2, %v2448_v8  ;;  %v780_v41 = vadd.f32 %v748_v3, %v2452_v19  ;;  %v719_v42 = vmul.f32 %v687_v46, %v2486_v0  ;;  %v2516_v44 = vadd.f32 %v2387_v52, %v2281_v15 }
 0x18a   : > { %v2510_v38 = vpop.eup %1831  ;;  %1837 = vtanh.f32 %v811_v9  ;;  %v782_v39 = vadd.f32 %v750_v10, %v2460_v17  ;;  %v721_v54 = vmul.f32 %v689_v47, %v2492_v36  ;;  %v720_v56 = vmul.f32 %v688_v51, %v2496_v4 }
 0x18b   : > { %v813_v45 = vmul.f32 0.7978846, %v781_v37  ;;  %v812_v49 = vmul.f32 0.7978846, %v780_v41  ;;  %v751_v3 = vmul.f32 0.044715, %v719_v42  ;;  %v690_v29 = vmul.f32 %v2516_v44, %v2516_v44 }
 0x18c   : > { %v814_v2 = vmul.f32 0.7978846, %v782_v39  ;;  %v2524_v9 = vadd.f32 %v2405_v11, %v2275_v12  ;;  %v753_v10 = vmul.f32 0.044715, %v721_v54  ;;  %v752_v46 = vmul.f32 0.044715, %v720_v56 }
 0x18d   : > { %1839 = vtanh.f32 %v813_v45  ;;  %v2528_v52 = vadd.f32 %v2407_v7, %v2277_v13  ;;  %v783_v37 = vadd.f32 %v751_v3, %v2486_v0  ;;  %v722_v41 = vmul.f32 %v690_v29, %v2516_v44 }
 0x18e   : > { %2762 = vst [vmem:[#allocation12_spill] sm:$0xff] %v2524_v9  ;;  %1841 = vtanh.f32 %v812_v49  ;;  %v691_v47 = vmul.f32 %v2524_v9, %v2524_v9  ;;  %v785_v11 = vadd.f32 %v753_v10, %v2492_v36  ;;  %v784_v39 = vadd.f32 %v752_v46, %v2496_v4 }
 0x18f   : > { %2763 = vst [vmem:[#allocation13_spill] sm:$0xff] %v2528_v52  ;;  %v2534_v51 = vpop.eup %1833  ;;  %1843 = vtanh.f32 %v814_v2  ;;  %v693_v42 = vmul.f32 %v2528_v52, %v2528_v52  ;;  %v815_v7 = vmul.f32 0.7978846, %v783_v37  ;;  %v754_v45 = vmul.f32 0.044715, %v722_v41 }
 0x190   : > { %v723_v49 = vmul.f32 %v691_v47, %v2524_v9  ;;  %v2543_v29 = vadd.f32 %v2411_v26, %v2279_v14  ;;  %v817_v54 = vmul.f32 0.7978846, %v785_v11  ;;  %v816_v56 = vmul.f32 0.7978846, %v784_v39 }
 0x191   : > { %v725_v3 = vmul.f32 %v693_v42, %v2528_v52  ;;  %v2548_v2 = vadd.f32 %v2415_v43, %v2281_v15  ;;  %v2550_v10 = vpop.eup %1835  ;;  %1845 = vtanh.f32 %v815_v7  ;;  %v786_v46 = vadd.f32 %v754_v45, %v2516_v44 }
 0x192   : > { %v755_v37 = vmul.f32 0.044715, %v723_v49  ;;  %v692_v41 = vmul.f32 %v2543_v29, %v2543_v29  ;;  %1847 = vtanh.f32 %v817_v54  ;;  %v2559_v11 = vadd.f32 %v2420_v50, %v2275_v12 }
 0x193   : > { %v757_v26 = vmul.f32 0.044715, %v725_v3  ;;  %v694_v47 = vmul.f32 %v2548_v2, %v2548_v2  ;;  %1849 = vtanh.f32 %v816_v56  ;;  %v818_v39 = vmul.f32 0.7978846, %v786_v46 }
 0x194   : > { %2764 = vst [vmem:[#allocation14_spill] sm:$0xff] %v2559_v11  ;;  %v2561_v43 = vpop.eup %1837  ;;  %v787_v42 = vadd.f32 %v755_v37, %v2524_v9  ;;  %v724_v7 = vmul.f32 %v692_v41, %v2543_v29  ;;  %v695_v54 = vmul.f32 %v2559_v11, %v2559_v11  ;;  %v2571_v3 = vadd.f32 %v2422_v53, %v2277_v13 }
 0x195   : > { %v789_v45 = vadd.f32 %v757_v26, %v2528_v52  ;;  %v726_v49 = vmul.f32 %v694_v47, %v2548_v2  ;;  %1851 = vtanh.f32 %v818_v39  ;;  %v2575_v56 = vadd.f32 %v2431_v58, %v2279_v14 }
 0x196   : > { %v819_v12 = vmul.f32 0.7978846, %v787_v42  ;;  %v756_v50 = vmul.f32 0.044715, %v724_v7  ;;  %v727_v26 = vmul.f32 %v695_v54, %v2559_v11  ;;  %v697_v47 = vmul.f32 %v2571_v3, %v2571_v3 }
 0x197   : > { %v2577_v46 = vpop.eup %1839  ;;  %v821_v37 = vmul.f32 0.7978846, %v789_v45  ;;  %v758_v41 = vmul.f32 0.044715, %v726_v49  ;;  %v696_v53 = vmul.f32 %v2575_v56, %v2575_v56  ;;  %v2589_v14 = vadd.f32 %v2433_v60, %v2281_v15 }
 0x198   : > { %v2582_v28 = vpop.eup %1841  ;;  %1853 = vtanh.f32 %v819_v12  ;;  %v788_v13 = vadd.f32 %v756_v50, %v2543_v29  ;;  %v759_v42 = vmul.f32 0.044715, %v727_v26  ;;  %v729_v7 = vmul.f32 %v697_v47, %v2571_v3 }
 0x199   : > { %v2591_v58 = vpop.eup %1843  ;;  %1855 = vtanh.f32 %v821_v37  ;;  %v790_v39 = vadd.f32 %v758_v41, %v2548_v2  ;;  %v728_v49 = vmul.f32 %v696_v53, %v2575_v56  ;;  %v698_v54 = vmul.f32 %v2589_v14, %v2589_v14 }
 0x19a   : > { %v820_v45 = vmul.f32 0.7978846, %v788_v13  ;;  %v860_v12 = vadd.f32 1.0, %v2409_v16  ;;  %v791_v15 = vadd.f32 %v759_v42, %v2559_v11  ;;  %v761_v60 = vmul.f32 0.044715, %v729_v7 }
 0x19b   : > { %v822_v50 = vmul.f32 0.7978846, %v790_v39  ;;  %v864_v52 = vadd.f32 1.0, %v2435_v61  ;;  %v2601_v37 = vpop.eup %1845  ;;  %v760_v41 = vmul.f32 0.044715, %v728_v49  ;;  %v730_v26 = vmul.f32 %v698_v54, %v2589_v14 }
 0x19c   : > { %1857 = vtanh.f32 %v820_v45  ;;  %v892_v47 = vmul.f32 0.5, %v860_v12  ;;  %v2604_v13 = vpop.eup %1847  ;;  %v823_v53 = vmul.f32 0.7978846, %v791_v15  ;;  %v793_v9 = vadd.f32 %v761_v60, %v2571_v3 }
 0x19d   : > { %1859 = vtanh.f32 %v822_v50  ;;  %v896_v16 = vmul.f32 0.5, %v864_v52  ;;  %v1850_v39 = vpop.eup %1849  ;;  %v792_v42 = vadd.f32 %v760_v41, %v2575_v56  ;;  %v762_v7 = vmul.f32 0.044715, %v730_v26 }
 0x19e   : > { %v924_v61 = vmul.f32 %v892_v47, %v2290_v22  ;;  %v862_v11 = vadd.f32 1.0, %v2413_v31  ;;  %1861 = vtanh.f32 %v823_v53  ;;  %v825_v45 = vmul.f32 0.7978846, %v793_v9 }
 0x19f   : > { %v928_v49 = vmul.f32 %v896_v16, %v2310_v34  ;;  %v866_v54 = vadd.f32 1.0, %v2440_v18  ;;  %v1852_v12 = vpop.eup %1851  ;;  %v824_v50 = vmul.f32 0.7978846, %v792_v42  ;;  %v794_v15 = vadd.f32 %v762_v7, %v2589_v14 }
 0x1a0   : > { %v894_v60 = vmul.f32 0.5, %v862_v11  ;;  %v868_v52 = vadd.f32 1.0, %v2488_v1  ;;  %1863 = vtanh.f32 %v825_v45  ;;  %v872_v22 = vadd.f32 1.0, %v2534_v51 }
 0x1a1   : > { %v956_v41 = vpack.c.bf16 %v928_v49, %v924_v61  ;;  %v898_v26 = vmul.f32 0.5, %v866_v54  ;;  %1865 = vtanh.f32 %v824_v50  ;;  %v826_v31 = vmul.f32 0.7978846, %v794_v15 }
 0x1a2   : > { %v2615_v47 = vpop.eup %1853  ;;  %v926_v34 = vmul.f32 %v894_v60, %v2293_v23  ;;  %v900_v9 = vmul.f32 0.5, %v868_v52  ;;  %v904_v11 = vmul.f32 0.5, %v872_v22  ;;  %v870_v1 = vadd.f32 1.0, %v2498_v5 }
 0x1a3   : > { %v2618_v18 = vpop.eup %1855  ;;  %1266 = vmatprep.mubr.bf16.mxu0 %v956_v41  ;;  %v930_v53 = vmul.f32 %v898_v26, %v2313_v35  ;;  %v874_v16 = vadd.f32 1.0, %v2550_v10  ;;  %1867 = vtanh.f32 %v826_v31  ;;  %v2765_v51 = vpack.c.bf16 %v2455_v6, %v2425_v55 }
 0x1a4   : > { %v932_v42 = vmul.f32 %v900_v9, %v2348_v27  ;;  %v867_v23 = vadd.f32 1.0, %v2474_v40  ;;  %v871_v7 = vadd.f32 1.0, %v2502_v24  ;;  %v936_v45 = vmul.f32 %v904_v11, %v2393_v59 }
 0x1a5   : > { %1267 = vmatmul.mubr.bf16.vlgmr.msra.gmra.mrb[16].mxu0 %v2765_v51  ;;  %v958_v61 = vpack.c.bf16 %v930_v53, %v926_v34  ;;  %v902_v35 = vmul.f32 0.5, %v870_v1  ;;  %v906_v49 = vmul.f32 0.5, %v874_v16  ;;  %v869_v10 = vadd.f32 1.0, %v2480_v48 }
 0x1a6   : > { %v1858_v54 = vpop.eup %1857  ;;  %v899_v5 = vmul.f32 0.5, %v867_v23  ;;  %v903_v50 = vmul.f32 0.5, %v871_v7  ;;  %v873_v15 = vadd.f32 1.0, %v2510_v38  ;;  %v960_v6 = vpack.c.bf16 %v936_v45, %v932_v42 }
 0x1a7   : > { %v1860_v55 = vpop.eup %1859  ;;  %1331 = vmatprep.mubr.bf16.mxu1 %v958_v61  ;;  %v934_v27 = vmul.f32 %v902_v35, %v2351_v30  ;;  %v938_v40 = vmul.f32 %v906_v49, %v2397_v63  ;;  %v876_v24 = vadd.f32 1.0, %v2582_v28  ;;  %v2766_v59 = vpack.c.bf16 %v2463_v21, %v2438_v62 }
 0x1a8   : > { %v931_v60 = vmul.f32 %v899_v5, %v2340_v20  ;;  %v935_v52 = vmul.f32 %v903_v50, %v2356_v32  ;;  %v901_v48 = vmul.f32 0.5, %v869_v10  ;;  %v905_v41 = vmul.f32 0.5, %v873_v15  ;;  %v1862_v38 = vpop.eup %1861  ;;  %1274 = vmatprep.mubr.bf16.mxu0 %v960_v6 }
 0x1a9   : > { %1332 = vmatmul.mubr.bf16.vlgmr.msra.gmra.mrb[16].mxu1 %v2766_v59  ;;  %v962_v26 = vpack.c.bf16 %v938_v40, %v934_v27  ;;  %v880_v22 = vadd.f32 1.0, %v1850_v39  ;;  %v908_v31 = vmul.f32 0.5, %v876_v24  ;;  %v878_v30 = vadd.f32 1.0, %v2591_v58 }
 0x1aa   : > { %v959_v63 = vpack.c.bf16 %v935_v52, %v931_v60  ;;  %v933_v28 = vmul.f32 %v901_v48, %v2343_v25  ;;  %v937_v34 = vmul.f32 %v905_v41, %v2359_v33  ;;  %v882_v62 = vadd.f32 1.0, %v1852_v12  ;;  %v1864_v21 = vpop.eup %1863 }
 0x1ab   : > { %1339 = vmatprep.mubr.bf16.mxu1 %v962_v26  ;;  %v912_v20 = vmul.f32 0.5, %v880_v22  ;;  %v940_v32 = vmul.f32 %v908_v31, %v2452_v19  ;;  %v910_v9 = vmul.f32 0.5, %v878_v30  ;;  %v875_v53 = vadd.f32 1.0, %v2561_v43  ;;  %v1866_v11 = vpop.eup %1865  ;;  %v2769_v31 = vld [vmem:[#allocation13_spill] sm:$0xff] }
 0x1ac   : > { %v961_v39 = vpack.c.bf16 %v937_v34, %v933_v28  ;;  %v914_v1 = vmul.f32 0.5, %v882_v62  ;;  %v879_v58 = vadd.f32 1.0, %v2601_v37  ;;  %v877_v16 = vadd.f32 1.0, %v2577_v46 }
 0x1ad   : > { %1275 = vmatmul.mubr.bf16.gmra.mrb[20].mxu0 %v959_v63  ;;  %v944_v25 = vmul.f32 %v912_v20, %v2496_v4  ;;  %v942_v33 = vmul.f32 %v910_v9, %v2460_v17  ;;  %v907_v12 = vmul.f32 0.5, %v875_v53  ;;  %v881_v51 = vadd.f32 1.0, %v2604_v13  ;;  %v1868_v42 = vpop.eup %1867 }
 0x1ae   : > { %v946_v19 = vmul.f32 %v914_v1, %v2516_v44  ;;  %v911_v23 = vmul.f32 0.5, %v879_v58  ;;  %v909_v43 = vmul.f32 0.5, %v877_v16  ;;  %v884_v7 = vadd.f32 1.0, %v1858_v54 }
 0x1af   : > { %v964_v61 = vpack.c.bf16 %v944_v25, %v940_v32  ;;  %v939_v45 = vmul.f32 %v907_v12, %v2429_v57  ;;  %v913_v35 = vmul.f32 0.5, %v881_v51  ;;  %v888_v37 = vadd.f32 1.0, %v1866_v11 }
 0x1b0   : > { %v966_v46 = vpack.c.bf16 %v946_v19, %v942_v33  ;;  %v943_v4 = vmul.f32 %v911_v23, %v2486_v0  ;;  %v941_v17 = vmul.f32 %v909_v43, %v2448_v8  ;;  %v916_v49 = vmul.f32 0.5, %v884_v7 }
 0x1b1   : > { %1340 = vmatmul.mubr.bf16.gmra.mrb[20].mxu1 %v961_v39  ;;  %1282 = vmatprep.mubr.bf16.mxu0 %v964_v61  ;;  %v945_v13 = vmul.f32 %v913_v35, %v2492_v36  ;;  %v920_v5 = vmul.f32 0.5, %v888_v37  ;;  %v886_v44 = vadd.f32 1.0, %v1860_v55  ;;  %v890_v50 = vadd.f32 1.0, %v1868_v42 }
 0x1b2   : > { %1347 = vmatprep.mubr.bf16.mxu1 %v966_v46  ;;  %v963_v54 = vpack.c.bf16 %v943_v4, %v939_v45  ;;  %v948_v10 = vmul.f32 %v916_v49, %v2543_v29  ;;  %v883_v57 = vadd.f32 1.0, %v2615_v47  ;;  %v887_v15 = vadd.f32 1.0, %v1862_v38  ;;  %v2767_v29 = vld [vmem:[#allocation12_spill] sm:$0xff]  ;;  %v2768_v47 = vld [vmem:[#allocation14_spill] sm:$0xff] }
 0x1b3   : > { %v965_v6 = vpack.c.bf16 %v945_v13, %v941_v17  ;;  %v952_v27 = vmul.f32 %v920_v5, %v2575_v56  ;;  %v918_v0 = vmul.f32 0.5, %v886_v44  ;;  %v922_v40 = vmul.f32 0.5, %v890_v50 }
 0x1b4   : > { %v915_v8 = vmul.f32 0.5, %v883_v57  ;;  %v919_v24 = vmul.f32 0.5, %v887_v15  ;;  %v885_v36 = vadd.f32 1.0, %v2618_v18  ;;  %v889_v59 = vadd.f32 1.0, %v1864_v21 }
 0x1b5   : > { %1283 = vmatmul.mubr.bf16.gmra.mrb[24].mxu0 %v963_v54  ;;  %v968_v55 = vpack.c.bf16 %v952_v27, %v948_v10  ;;  %v950_v60 = vmul.f32 %v918_v0, %v2548_v2  ;;  %v954_v52 = vmul.f32 %v922_v40, %v2589_v14  ;;  %v2668_v14 = vld [vmem:[%s2744_s4] ss:$0 sm:$0xff] }
 0x1b6   : > { %v947_v48 = vmul.f32 %v915_v8, %v2767_v29  ;;  %v951_v41 = vmul.f32 %v919_v24, %v2768_v47  ;;  %v917_v38 = vmul.f32 0.5, %v885_v36  ;;  %v921_v26 = vmul.f32 0.5, %v889_v59 }
 0x1b7   : > { %1290 = vmatprep.mubr.bf16.mxu0 %v968_v55  ;;  %v970_v56 = vpack.c.bf16 %v954_v52, %v950_v60 }
 0x1b8   : > { %v967_v22 = vpack.c.bf16 %v951_v41, %v947_v48  ;;  %v949_v30 = vmul.f32 %v917_v38, %v2769_v31  ;;  %v953_v18 = vmul.f32 %v921_v26, %v2571_v3 }
 0x1b9   : > { %1348 = vmatmul.mubr.bf16.gmra.mrb[24].mxu1 %v965_v6 }
 0x1ba   : > { %1355 = vmatprep.mubr.bf16.mxu1 %v970_v56  ;;  %v969_v63 = vpack.c.bf16 %v953_v18, %v949_v30 }
 0x1bd   : > { %1291 = vmatmul.mubr.bf16.gmra.mrb[28].mxu0 %v967_v22 }
 0x1c1   : > { %1356 = vmatmul.mubr.bf16.gmra.mrb[28].mxu1 %v969_v63 }
 0x278   : > { %v1583_v2 = vpop.f32.mrb[16].mxu0 }
 0x279   : > { %v1584_v28 = vpop.f32.mrb[17].mxu0 }
 0x27a   : > { %v1585_v34 = vadd.f32 %v1584_v28, %v1583_v2  ;;  %v1586_v62 = vpop.f32.mrb[18].mxu0 }
 0x27b   : > { %v1587_v21 = vpop.f32.mrb[19].mxu0 }
 0x27c   : > { %v1623_v20 = vpop.f32.mrb[16].mxu1  ;;  %v1269_v32 = vadd.f32 %v1585_v34, %v2668_v14  ;;  %v1588_v9 = vadd.f32 %v1587_v21, %v1586_v62 }
 0x27d   : > { %v1624_v3 = vpop.f32.mrb[17].mxu1 }
 0x27e   : > { %v1625_v53 = vadd.f32 %v1624_v3, %v1623_v20  ;;  %v1626_v11 = vpop.f32.mrb[18].mxu1  ;;  %v1272_v39 = vadd.f32 %v1588_v9, %v2668_v14 }
 0x27f   : > { %v1627_v1 = vpop.f32.mrb[19].mxu1 }
 0x280   : > { %v1334_v58 = vadd.f32 %v1625_v53, %v1269_v32  ;;  %v1628_v16 = vadd.f32 %v1627_v1, %v1626_v11  ;;  %v1589_v25 = vpop.f32.mrb[20].mxu0 }
 0x281   : > { %v1590_v33 = vpop.f32.mrb[21].mxu0 }
 0x282   : > { %1364 = vst [vmem:[%s2673_s28] sm:$0xff] %v1334_v58  ;;  %v1337_v12 = vadd.f32 %v1628_v16, %v1272_v39  ;;  %v1591_v51 = vadd.f32 %v1590_v33, %v1589_v25  ;;  %v1592_v42 = vpop.f32.mrb[22].mxu0 }
 0x283   : > { %v1593_v19 = vpop.f32.mrb[23].mxu0 }
 0x284   : > { %1365 = vst [vmem:[%s2673_s28 + $0x8] sm:$0xff] %v1337_v12  ;;  %v1629_v23 = vpop.f32.mrb[20].mxu1  ;;  %v1277_v43 = vadd.f32 %v1591_v51, %v2668_v14  ;;  %v1594_v7 = vadd.f32 %v1593_v19, %v1592_v42 }
 0x285   : > { %v1630_v61 = vpop.f32.mrb[21].mxu1 }
 0x286   : > { %v1631_v45 = vadd.f32 %v1630_v61, %v1629_v23  ;;  %v1632_v35 = vpop.f32.mrb[22].mxu1  ;;  %v1280_v37 = vadd.f32 %v1594_v7, %v2668_v14 }
 0x287   : > { %v1633_v46 = vpop.f32.mrb[23].mxu1 }
 0x288   : > { %v1342_v4 = vadd.f32 %v1631_v45, %v1277_v43  ;;  %v1634_v17 = vadd.f32 %v1633_v46, %v1632_v35  ;;  %v1595_v49 = vpop.f32.mrb[24].mxu0 }
 0x289   : > { %v1596_v13 = vpop.f32.mrb[25].mxu0 }
 0x28a   : > { %1366 = vst [vmem:[%s2673_s28 + $0x10] sm:$0xff] %v1342_v4  ;;  %v1345_v5 = vadd.f32 %v1634_v17, %v1280_v37  ;;  %v1597_v44 = vadd.f32 %v1596_v13, %v1595_v49  ;;  %v1598_v50 = vpop.f32.mrb[26].mxu0 }
 0x28b   : > { %v1599_v54 = vpop.f32.mrb[27].mxu0 }
 0x28c   : > { %1367 = vst [vmem:[%s2673_s28 + $0x18] sm:$0xff] %v1345_v5  ;;  %v1635_v10 = vpop.f32.mrb[24].mxu1  ;;  %v1285_v57 = vadd.f32 %v1597_v44, %v2668_v14  ;;  %v1600_v15 = vadd.f32 %v1599_v54, %v1598_v50 }
 0x28d   : > { %v1636_v6 = vpop.f32.mrb[25].mxu1 }
 0x28e   : > { %v1637_v27 = vadd.f32 %v1636_v6, %v1635_v10  ;;  %v1638_v0 = vpop.f32.mrb[26].mxu1  ;;  %v1288_v40 = vadd.f32 %v1600_v15, %v2668_v14 }
 0x28f   : > { %v1639_v8 = vpop.f32.mrb[27].mxu1 }
 0x290   : > { %v1350_v24 = vadd.f32 %v1637_v27, %v1285_v57  ;;  %v1640_v36 = vadd.f32 %v1639_v8, %v1638_v0  ;;  %v1601_v59 = vpop.f32.mrb[28].mxu0 }
 0x291   : > { %v1602_v55 = vpop.f32.mrb[29].mxu0 }
 0x292   : > { %1368 = vst [vmem:[%s2673_s28 + $0x20] sm:$0xff] %v1350_v24  ;;  %v1353_v60 = vadd.f32 %v1640_v36, %v1288_v40  ;;  %v1603_v52 = vadd.f32 %v1602_v55, %v1601_v59  ;;  %v1604_v29 = vpop.f32.mrb[30].mxu0 }
 0x293   : > { %v1605_v48 = vpop.f32.mrb[31].mxu0 }
 0x294   : > { %1369 = vst [vmem:[%s2673_s28 + $0x28] sm:$0xff] %v1353_v60  ;;  %v1641_v47 = vpop.f32.mrb[28].mxu1  ;;  %v1293_v41 = vadd.f32 %v1603_v52, %v2668_v14  ;;  %v1606_v38 = vadd.f32 %v1605_v48, %v1604_v29 }
 0x295   : > { %v1642_v26 = vpop.f32.mrb[29].mxu1 }
 0x296   : > { %v1643_v56 = vadd.f32 %v1642_v26, %v1641_v47  ;;  %v1644_v22 = vpop.f32.mrb[30].mxu1  ;;  %v1296_v31 = vadd.f32 %v1606_v38, %v2668_v14 }
 0x297   : > { %v1645_v30 = vpop.f32.mrb[31].mxu1 }
 0x298   : > { %v1358_v18 = vadd.f32 %v1643_v56, %v1293_v41  ;;  %v1646_v63 = vadd.f32 %v1645_v30, %v1644_v22 }
 0x29a   : > { %1370 = vst [vmem:[%s2673_s28 + $0x30] sm:$0xff] %v1358_v18  ;;  %v1361_v2 = vadd.f32 %v1646_v63, %v1296_v31 }
 0x29c   : > { %1371 = vst [vmem:[%s2673_s28 + $0x38] sm:$0xff] %v1361_v2 }
 0x29d   : > { %1968 = shalt.err (!%p1965_p2)
}
 0x29e   : > { %s1969_s24 = scalar_lea.hbm %s2694_s23, 1024  ;;  %s1973_s13 = scalar_lea.hbm %s2745_s5, 2048 }
 0x29f   : > { %p1970_p13 = scmp.ne.s32.totalorder %s2694_s23, %s1969_s24  ;;  %p1974_p4 = scmp.lt.u32.totalorder %s2694_s23, %s2745_s5 }
 0x2a0   : > { %p1975_p7 = scmp.lt.u32.totalorder %s1973_s13, %s1969_s24  ;;  %p1977_p11 = scmp.lt.u32.totalorder %s1969_s24, %s2694_s23 }
 0x2a1   : > { %p1971_p6 = pnand %p1970_p13, %p2770_p0 }
 0x2a2   : > { %p1976_p8 = por %p1975_p7, %p1974_p4 }
 0x2a3   : > { %p1972_p10 = pneg %p1971_p6 }
 0x2a4   : > { %p1978_p1 = por %p1977_p11, %p1976_p8 }
 0x2a6   : > { %p1979_p3 = pnand %p1978_p1, %p1972_p10 }
 0x2a8   : > { %1982 = shalt.err (!%p1979_p3)
}
 0x2a9   : > { %s2036_s15 = smov 128   ;;  %s2037_s30 = smov 8  }
 0x2aa   : > { %1657 = dma.vmem_to_hbm [thread:$0]  (%p2770_p0), %s2689_s14, 1024, %s2694_s23, %s1373_s7, %s2036_s15, %s2036_s15, %s2037_s30  }
 0x2ab PF: > { %s1401_s11 = sand.u32 1, %s2013_s18   ;;  %p2771_p5 = scmp.ne.s32.totalorder %s2753_s25, 0 }
 0x2ac   : > { %p2772_p9 = scmp.ge.s32.totalorder %s2025_s21, 2  ;;  %s1402_s6 = scalar_lea.sflag [#allocation4], %s1401_s11 }
 0x2ae   : > { %p1671_p12 = pnand %p2772_p9, %p2771_p5 }
 0x2b0   : > { %2008 = dma.done.wait (!%p1671_p12), %s1402_s6, 1024  }
 0x2b1   : > { %2010 = vsyncadd (!%p1671_p12), %s1402_s6, 4294966272  ;;  %p19_p2 = scmp.ge.s32.totalorder %s2181_s16, 4   ;;  %s2773_s18 = smov %s2017_s19 }
 0x2b2   : > { %s2774_s19 = smov %s2021_s20  ;;  %s2775_s20 = smov %s2190_s27 }
 0x2b3   : > { %s2776_s21 = smov %s2181_s16  ;;  %21 = sbr.rel (!%p19_p2) target bundleno = 6 (0x6), region = 93 }
 0x2ba   :  { %1407 = vsyncpa [#allocation3], 1 }
 0x2bb   :  { %1409 = vsyncpa [#allocation3 + $0x1], 1 }
 0x2bc   :  { %1410 = vsyncpa [#allocation6], 1 }
 0x2bd   :  { %1411 = vsyncpa [#allocation4], 1 }
 0x2be   :  { %1413 = vsyncpa [#allocation4 + $0x1], 1 }

</bundles_post_ra>
